<compile_context>
chip_gen: v5e
topology: v5e:2x2
jax: 0.10.0
libtpu: 0.0.40
codegen_flags: <defaults>
</compile_context>

<pallas_src>
import math
import functools

import jax
import jax.numpy as jnp
from jax.experimental import pallas as pl
from jax.experimental.pallas import tpu as pltpu


_PER_BLOCK_BYTES = 4 * 1024 * 1024     # per-buffer tiling budget (6 dbl-buffered bufs -> ~24 MiB)
_VMEM_LIMIT_BYTES = 32 * 1024 * 1024   # explicit scoped-VMEM request; fits all generations


def _make_pe_table(dim: int, max_len: int = 5000) -> jnp.ndarray:
    """Build the (max_len, dim) sinusoidal table exactly like the PyTorch __init__."""
    if dim % 2 != 0:
        raise ValueError(f"Cannot use sin/cos positional encoding with odd dim (got dim={dim})")
    position = jnp.arange(0, max_len, dtype=jnp.float32)[:, None]            # (max_len, 1)
    div_term = jnp.exp(
        jnp.arange(0, dim, 2, dtype=jnp.float32) * -(math.log(10000.0) / dim)
    )                                                                        # (dim//2,)
    angles = position * div_term[None, :]                                    # (max_len, dim//2)
    pe = jnp.zeros((max_len, dim), dtype=jnp.float32)
    pe = pe.at[:, 0::2].set(jnp.sin(angles))
    pe = pe.at[:, 1::2].set(jnp.cos(angles))
    return pe


def _choose_row_tile(rows_total: int, lane_dim: int, itemsize: int):
    """Pick a row-tile size: multiple of 8 that divides (possibly padded) rows_total,
    bounded by the per-block VMEM budget.  Returns (tile_rows, padded_rows)."""
    budget_rows = max(8, _PER_BLOCK_BYTES // max(1, lane_dim * itemsize))
    budget_rows = (budget_rows // 8) * 8
    if rows_total <= budget_rows:
        return rows_total, rows_total                 # single full tile (always legal)
    t = budget_rows
    while t >= 8:
        if rows_total % t == 0:
            return t, rows_total
        t -= 8
    # no multiple-of-8 divisor <= budget: pad rows up to a multiple of 8 and retry
    padded = ((rows_total + 7) // 8) * 8
    t = budget_rows
    while t >= 8:
        if padded % t == 0:
            return t, padded
        t -= 8
    return 8, padded


def _pe_seq_kernel(x_ref, pe_ref, o_ref, *, scale):
    # x_ref: (1, TS, D) tile of one batch element.
    # pe_ref: (TS, D) — its block index depends only on the seq-tile grid axis,
    #         so it is DMA'd once and stays VMEM-resident across the batch loop.
    x = x_ref[...].astype(jnp.float32)
    o_ref[...] = (x * scale + pe_ref[...][None, :, :]).astype(o_ref.dtype)


def _pe_step_kernel(x_ref, pe_ref, o_ref, *, scale):
    # x_ref: (TR, D) — batch (and seq) folded into the sublane axis.
    # pe_ref: (1, D) — the single pe[step] row, broadcast over sublanes.
    x = x_ref[...].astype(jnp.float32)
    o_ref[...] = (x * scale + pe_ref[...]).astype(o_ref.dtype)


def positional_encoding(emb: jnp.ndarray,
                        pe_table: jnp.ndarray,
                        step: int | None = None) -> jnp.ndarray:
    """Apply sinusoidal positional encoding via Pallas TPU kernels.

    emb:      (batch, seq_len, dim)
    pe_table: (max_len, dim) float32
    step:     if not None, every position uses pe[step] (decode path, seq_len==1).
    """
    B, S, D = emb.shape
    scale = float(math.sqrt(D))
    itemsize = jnp.dtype(emb.dtype).itemsize

    if step is not None:
        # ---- stepwise decode path: fold (B, S) rows into sublanes ----------
        R = B * S
        x2 = emb.reshape(R, D)
        pe_row = jnp.reshape(pe_table[step], (1, D))
        tr, r_pad = _choose_row_tile(R, D, itemsize)
        if r_pad != R:
            x2 = jnp.pad(x2, ((0, r_pad - R), (0, 0)))
        out = pl.pallas_call(
            functools.partial(_pe_step_kernel, scale=scale),
            out_shape=jax.ShapeDtypeStruct((r_pad, D), emb.dtype),
            grid_spec=pltpu.PrefetchScalarGridSpec(
                num_scalar_prefetch=0,
                grid=(r_pad // tr,),
                in_specs=[
                    pl.BlockSpec((tr, D), lambda i: (i, 0)),
                    pl.BlockSpec((1, D), lambda i: (0, 0)),   # resident PE row
                ],
                out_specs=pl.BlockSpec((tr, D), lambda i: (i, 0)),
            ),
            compiler_params=pltpu.CompilerParams(
                dimension_semantics=("parallel",),
                vmem_limit_bytes=_VMEM_LIMIT_BYTES),
        )(x2, pe_row)
        return out[:R].reshape(B, S, D)

    # ---- full-sequence path: tile seq axis; grid = (seq_tiles, batch) ------
    ts, s_pad = _choose_row_tile(S, D, itemsize)
    x = emb
    pe_slice = pe_table[:S, :]
    if s_pad != S:
        x = jnp.pad(x, ((0, 0), (0, s_pad - S), (0, 0)))
        pe_slice = jnp.pad(pe_slice, ((0, s_pad - S), (0, 0)))

    out = pl.pallas_call(
        functools.partial(_pe_seq_kernel, scale=scale),
        out_shape=jax.ShapeDtypeStruct((B, s_pad, D), emb.dtype),
        grid_spec=pltpu.PrefetchScalarGridSpec(
            num_scalar_prefetch=0,
            grid=(s_pad // ts, B),                       # batch innermost -> PE reuse
            in_specs=[
                pl.BlockSpec((1, ts, D), lambda i, b: (b, i, 0)),
                pl.BlockSpec((ts, D), lambda i, b: (i, 0)),   # batch-invariant PE tile
            ],
            out_specs=pl.BlockSpec((1, ts, D), lambda i, b: (b, i, 0)),
        ),
        compiler_params=pltpu.CompilerParams(
            dimension_semantics=("parallel", "arbitrary"),
            vmem_limit_bytes=_VMEM_LIMIT_BYTES),
    )(x, pe_slice)

    if s_pad != S:
        out = out[:, :S, :]
    # TODO(synk): nn.Dropout is identity in eval mode; training-mode dropout
    # (stochastic masking via pltpu.prng_*) is not implemented here.
    return out


def positional_encoding_ref(emb, pe_table, step=None):
    """Pure-JAX reference of the PyTorch forward (eval mode)."""
    B, S, D = emb.shape
    emb = emb * math.sqrt(D)
    if step is None:
        return emb + pe_table[None, :S, :]
    return emb + pe_table[step][None, None, :]


if __name__ == "__main__":
    key = jax.random.PRNGKey(0)
    B, S, D = 2, 8, 32            # batch, seq_len, dim (dim must be even)
    max_len = 128

    emb = jax.random.normal(key, (B, S, D), dtype=jnp.float32)
    pe_table = _make_pe_table(D, max_len)

    # full-sequence path
    out = positional_encoding(emb, pe_table, step=None)
    out = jax.block_until_ready(out)
    ref = positional_encoding_ref(emb, pe_table, step=None)
    assert out.shape == ref.shape
    assert jnp.allclose(out, ref, atol=1e-5, rtol=1e-5), "full-seq mismatch"

    # stepwise path (seq_len = 1, use encoding at position `step`)
    emb_step = jax.random.normal(jax.random.PRNGKey(1), (B, 1, D), dtype=jnp.float32)
    out_step = positional_encoding(emb_step, pe_table, step=5)
    out_step = jax.block_until_ready(out_step)
    ref_step = positional_encoding_ref(emb_step, pe_table, step=5)
    assert out_step.shape == ref_step.shape
    assert jnp.allclose(out_step, ref_step, atol=1e-5, rtol=1e-5), "stepwise mismatch"

    print("KERNEL_OK")
</pallas_src>

<mosaic_0001>
module attributes {stable_mosaic.version = 11 : i64} {
  func.func @_pe_seq_kernel(%arg0: i32, %arg1: i32, %arg2: memref<1x8x32xf32, #tpu.memory_space<vmem>>, %arg3: memref<8x32xf32, #tpu.memory_space<vmem>>, %arg4: memref<1x8x32xf32, #tpu.memory_space<vmem>>) attributes {dimension_semantics = [#tpu.dimension_semantics<parallel>, #tpu.dimension_semantics<arbitrary>], iteration_bounds = array<i64: 1, 2>, scalar_prefetch = 0 : i64, scratch_operands = 0 : i64, tpu.core_type = #tpu.core_type<tc>, window_params = [{transform_indices = @transform_0, window_bounds = array<i64: 1, 8, 32>}, {transform_indices = @transform_1, window_bounds = array<i64: 8, 32>}, {transform_indices = @transform_2, window_bounds = array<i64: 1, 8, 32>}]} {
    %c0 = arith.constant 0 : index
    %c0_0 = arith.constant 0 : index
    %c0_1 = arith.constant 0 : index
    %0 = vector.load %arg2[%c0, %c0_0, %c0_1] : memref<1x8x32xf32, #tpu.memory_space<vmem>>, vector<1x8x32xf32>
    %cst = arith.constant 5.65685415 : f32
    %1 = vector.broadcast %cst : f32 to vector<1x8x32xf32>
    %2 = arith.mulf %0, %1 : vector<1x8x32xf32>
    %c0_2 = arith.constant 0 : index
    %c0_3 = arith.constant 0 : index
    %3 = vector.load %arg3[%c0_2, %c0_3] : memref<8x32xf32, #tpu.memory_space<vmem>>, vector<8x32xf32>
    %4 = vector.shape_cast %3 : vector<8x32xf32> to vector<1x8x32xf32>
    %5 = arith.addf %2, %4 : vector<1x8x32xf32>
    %c0_4 = arith.constant 0 : index
    %c0_5 = arith.constant 0 : index
    %c0_6 = arith.constant 0 : index
    %6 = vector.load %arg4[%c0_4, %c0_5, %c0_6] : memref<1x8x32xf32, #tpu.memory_space<vmem>>, vector<1x8x32xf32>
    tpu.vector_store %arg4[%c0_4, %c0_5, %c0_6], %5 {strides = array<i32>} : memref<1x8x32xf32, #tpu.memory_space<vmem>>, vector<1x8x32xf32>,
    return
  }
  func.func @transform_0(%arg0: i32, %arg1: i32) -> (i32, i32, i32) {
    %c0_i32 = arith.constant 0 : i32
    %c0_i32_0 = arith.constant 0 : i32
    return %arg1, %arg0, %c0_i32 : i32, i32, i32
  }
  func.func @transform_1(%arg0: i32, %arg1: i32) -> (i32, i32) {
    %c0_i32 = arith.constant 0 : i32
    %c0_i32_0 = arith.constant 0 : i32
    return %arg0, %c0_i32 : i32, i32
  }
  func.func @transform_2(%arg0: i32, %arg1: i32) -> (i32, i32, i32) {
    %c0_i32 = arith.constant 0 : i32
    %c0_i32_0 = arith.constant 0 : i32
    return %arg1, %arg0, %c0_i32 : i32, i32, i32
  }
}

</mosaic_0001>

<bundles_post_ra>
// kernel: tpu_custom_call.1
= control target key start
LH: loop header
LB: loop body
LE: loop exit
PB: predicated region body
PF: predicated region fallthrough
CT: control target
= control target key end

     0   :  { %7 = vsyncpa [#allocation3], 0  ;;  %s716_s0 = inlined_call_operand.hbm [shape: f32[2,8,32], index: 0, kind: input, shape index: {}]   ;;  %s717_s1 = inlined_call_operand.hbm [shape: f32[8,32], index: 1, kind: input, shape index: {}]   ;;  %s718_s2 = inlined_call_operand.hbm [shape: f32[2,8,32], index: 2, kind: output, shape index: {}]  }
   0x1   :  { %9 = vsyncpa [#allocation3 + $0x1], 0 }
   0x2   :  { %10 = vsyncpa [#allocation6], 0 }
   0x3   :  { %11 = vsyncpa [#allocation4], 0 }
   0x4   :  { %13 = vsyncpa [#allocation4 + $0x1], 0  ;;  %s567_s9 = smov 0   ;;  %s569_s10 = smov 0  }
   0x5   :  { %s571_s11 = smov 0   ;;  %s573_s12 = smov 0  }
   0x6   :  { %s575_s13 = smov 0   ;;  %s577_s14 = smov 0  }
   0x7 LB: > { %s315_s15 = sadd.s32 4294967295, %s549_s14   ;;  %s316_s16 = sadd.s32 4294967294, %s549_s14   ;;  %s549_s14 = sphi %s577_s14, %s19_s14   ;;  %s545_s13 = sphi %s575_s13, %s730_s13   ;;  %s541_s12 = sphi %s573_s12, %s729_s12   ;;  %s537_s11 = sphi %s571_s11, %s728_s11   ;;  %s533_s10 = sphi %s569_s10, %s727_s10   ;;  %s529_s9 = sphi %s567_s9, %s726_s9  }
   0x8   : > { %p53_p0 = scmp.ne.s32.totalorder %s533_s10, %s529_s9  ;;  %p601_p1 = scmp.eq.s32.totalorder %s315_s15, 0 }
   0x9   : > { %p605_p2 = scmp.eq.s32.totalorder %s315_s15, 1  ;;  %p111_p3 = scmp.eq.s32.totalorder %s316_s16, 1 }
   0xa   : > { %p611_p4 = por %p601_p1, %p53_p0  ;;  %p317_p5 = scmp.ge.s32.totalorder %s549_s14, 1 }
   0xb   : > { %p616_p6 = por %p111_p3, %p53_p0  ;;  %p118_p7 = scmp.lt.s32.totalorder %s549_s14, 3 }
   0xc   : > { %s132_s23 = sshll.u32 %s717_s1, 4  ;;  %p319_p9 = scmp.ge.s32.totalorder %s549_s14, 2  ;;  %s133_s23 = int_to_ptr.hbm [resolvable:$true] %s132_s23 }
   0xd   : > { %p624_p8 = pnand %p317_p5, %p118_p7  ;;  %s551_s25 = smov [#allocation5]  }
   0xe   : > { %s134_s26 = sshll.u32 %s551_s25, 4  ;;  %s28_s27 = sadd.s32 1, %s545_s13  ;;  %s135_s26 = int_to_ptr.vmem [resolvable:$true] %s134_s26 }
   0xf   : > { %p338_p10 = pneg %p624_p8  ;;  %p29_p12 = scmp.ge.s32.totalorder %s28_s27, 2 }
  0x10   : > { %s40_s28 = sadd.s32 1, %s537_s11  ;;  %p47_p13 = scmp.ne.s32.totalorder %s537_s11, %s533_s10 }
  0x11   : > { %p339_p11 = pnand %p338_p10, %p601_p1  ;;  %p48_p0 = scmp.eq.s32.totalorder %s549_s14, 0 }
  0x12   : > { %s732_s27 = smov (%p29_p12, %s28_s27), 0  ;;  %p646_p5 = por %p605_p2, %p47_p13 }
  0x13   : > { %341 = dma.hbm_to_vmem [thread:$0]  (!%p339_p11), %s133_s23, 128, %s135_s26, [#allocation6]  }
  0x14   : > { %p640_p3 = por %p48_p0, %p47_p13  ;;  %s35_s3 = ssub.s32 %s545_s13, %s732_s27 }
  0x15   : > { %p351_p7 = scmp.lt.s32.totalorder %s549_s14, 2  ;;  %p38_p10 = scmp.eq.s32.totalorder %s35_s3, 0 }
  0x16   : > { %s145_s4 = sand.u32 1, %s537_s11   ;;  %s321_s7 = sshll.u32 %s545_s13, 3 }
  0x17   : > { %s320_s5 = sshll.u32 %s145_s4, 3  ;;  %s154_s16 = scalar_lea.hbm %s716_s0, %s321_s7 }
  0x18   : > { %s655_s6 = scalar_select %p38_p10, %s537_s11, %s40_s28  }
  0x19   : > { %s149_s21 = scalar_lea.vmem [#allocation2], %s320_s5  ;;  %s156_s18 = sshll.u32 %s154_s16, 4  ;;  %s157_s18 = int_to_ptr.hbm [resolvable:$true] %s156_s18 }
  0x1a   : > { %s158_s22 = sshll.u32 %s149_s21, 4  ;;  %p343_p2 = pnand %p351_p7, %p640_p3  ;;  %s159_s22 = int_to_ptr.vmem [resolvable:$true] %s158_s22 }
  0x1b   : > { %s146_s23 = scalar_lea.sflag [#allocation3], %s145_s4  ;;  %167 = sbr.rel (%p624_p8) target bundleno = 50 (0x32), region = 28 }
  0x1c   : > { %345 = dma.hbm_to_vmem [thread:$0]  (!%p343_p2), %s157_s18, 128, %s159_s22, %s146_s23  }
  0x1d   : > { %s666_s25 = sand.u32 (!%p624_p8), 1, %s533_s10  }
  0x1e   : > { %s323_s26 = sshll.u32 (!%p624_p8), %s666_s25, 3  ;;  %s170_s28 = scalar_lea.sflag (!%p624_p8), [#allocation3], %s666_s25 }
  0x1f   : > { %s173_s3 = scalar_lea.vmem (!%p624_p8), [#allocation2], %s323_s26 }
  0x20   : > { %516 = dma.done.wait (%p611_p4), %s170_s28, 128  }
  0x21   : > { %518 = vsyncadd (%p611_p4), %s170_s28, 4294967168 }
  0x22   : > { %520 = dma.done.wait (%p601_p1), [#allocation6], 128  }
  0x23   : > { %522 = vsyncadd (%p601_p1), [#allocation6], 4294967168  ;;  %s327_s24 = sshll.u32 %s541_s12, 3  ;;  %v200_v0 = vld [vmem:[%s173_s3] sm:$0xff]  ;;  %v202_v1 = vld [vmem:[#allocation5] sm:$0xff]  ;;  %s199_s7 = scalar_lea.vmem [#allocation7], %s323_s26 }
  0x24   : > { %s218_s5 = scalar_lea.hbm %s718_s2, %s327_s24  ;;  %s220_s8 = sshll.u32 %s199_s7, 4  ;;  %v201_v2 = vmul.f32 5.656854, %v200_v0  ;;  %vm204_vm0 = vcmask 261120   ;;  %s221_s8 = int_to_ptr.vmem [resolvable:$true] %s220_s8 }
  0x25   : > { %s222_s19 = sshll.u32 %s218_s5, 4  ;;  %s207_s17 = scalar_lea.sflag [#allocation4], %s666_s25  ;;  %s223_s19 = int_to_ptr.hbm [resolvable:$true] %s222_s19 }
  0x26   : > { %v203_v3 = vadd.f32 %v202_v1, %v201_v2  ;;  %s477_s15 = sshra.s32 %s223_s19, 4  ;;  %s483_s22 = scalar_lea.hbm %s718_s2, 16  ;;  %s478_s15 = int_to_ptr.hbm [resolvable:$true] %s477_s15 }
  0x27   : > { %s479_s12 = scalar_lea.hbm %s478_s15, 8  ;;  %p484_p11 = scmp.lt.s32.totalorder %s478_s15, %s718_s2 }
  0x28   : > { %205 = vst.msk [vmem:[%s199_s7] sm:$0xff] %vm204_vm0, %v203_v3  ;;  %p480_p1 = scmp.ne.s32.totalorder %s478_s15, %s479_s12  ;;  %p485_p12 = scmp.lt.s32.totalorder %s483_s22, %s479_s12 }
  0x2a   : > { %p481_p4 = pnand %p480_p1, %p646_p5  ;;  %p486_p13 = por %p485_p12, %p484_p11 }
  0x2c   : > { %p482_p8 = pneg %p481_p4 }
  0x2e   : > { %p487_p0 = pnand %p486_p13, %p482_p8 }
  0x30   : > { %490 = shalt.err (!%p487_p0)
}
  0x31   : > { %336 = dma.vmem_to_hbm [thread:$0]  (%p646_p5), %s221_s8, 128, %s223_s19, %s207_s17  }
  0x32 PF: > { %s234_s25 = sand.u32 1, %s529_s9   ;;  %p347_p3 = pnand %p319_p9, %p616_p6 }
  0x33   : > { %s235_s26 = scalar_lea.sflag [#allocation4], %s234_s25 }
  0x34   : > { %p348_p7 = pneg %p347_p3 }
  0x36   : > { %524 = dma.done.wait (%p348_p7), %s235_s26, 128  }
  0x37   : > { %526 = vsyncadd (%p348_p7), %s235_s26, 4294967168  ;;  %s19_s14 = sadd.s32 1, %s549_s14   ;;  %s726_s9 = smov %s533_s10 }
  0x38   : > { %p16_p10 = scmp.ge.s32.totalorder %s19_s14, 4   ;;  %s727_s10 = smov %s537_s11 }
  0x39   : > { %s728_s11 = smov %s655_s6  ;;  %s729_s12 = smov %s545_s13 }
  0x3a   : > { %s730_s13 = smov %s732_s27  ;;  %18 = sbr.rel (!%p16_p10) target bundleno = 7 (0x7), region = 78 }
  0x3f   :  { %241 = vsyncpa [#allocation3], 1 }
  0x40   :  { %243 = vsyncpa [#allocation3 + $0x1], 1 }
  0x41   :  { %244 = vsyncpa [#allocation6], 1 }
  0x42   :  { %245 = vsyncpa [#allocation4], 1 }
  0x43   :  { %247 = vsyncpa [#allocation4 + $0x1], 1 }

</bundles_post_ra>
